<compile_context>
chip_gen: v5e
topology: v5e:2x2
jax: 0.10.0
libtpu: 0.0.40
codegen_flags: <defaults>
</compile_context>

<pallas_src>
import functools

import jax
import jax.numpy as jnp
from jax.experimental import pallas as pl
from jax.experimental.pallas import tpu as pltpu

EPS = 1e-6  # matches partial(nn.LayerNorm, eps=1e-06) in the PyTorch module


def _round_up(a, b):
    return (a + b - 1) // b * b


def _vmem_capacity_bytes():
    """Generation-aware physical per-core VMEM, with a conservative fallback."""
    try:
        cap = getattr(pltpu.get_tpu_info(), "vmem_capacity_bytes", None)
        if cap:
            return int(cap)
    except Exception:
        pass
    return 64 * 1024 * 1024  # v7x per-TC size; safe lower bound on all gens


def _make_patch_embed_kernel(d_real, d_pad):
    """Fused (matmul + bias + LayerNorm) kernel body.

    d_real: true embedding dim (LayerNorm statistics use this).
    d_pad : lane-padded embedding dim (multiple of 128).
    """
    inv_d = 1.0 / float(d_real)
    need_mask = d_pad != d_real

    def kernel(x_ref, w_ref, p_ref, o_ref):
        # Patch projection on the MXU, f32 accumulation.
        y = jnp.dot(x_ref[...], w_ref[...], preferred_element_type=jnp.float32)
        y = y + p_ref[0:1, :]  # conv bias, (tm, D_pad) + (1, D_pad), f32

        # Padded lanes of y are exactly 0 (weight columns and bias are zero in
        # the padded lanes), so the mean needs no mask.
        mean = jnp.sum(y, axis=-1, keepdims=True) * inv_d
        cen = y - mean
        if need_mask:
            lane = jax.lax.broadcasted_iota(jnp.int32, cen.shape, dimension=1)
            cen_m = jnp.where(lane < d_real, cen, 0.0)
        else:
            cen_m = cen
        var = jnp.sum(cen_m * cen_m, axis=-1, keepdims=True) * inv_d
        yn = cen * jax.lax.rsqrt(var + EPS)

        # gamma/beta are zero in padded lanes -> padded output columns are 0.
        out = yn * p_ref[1:2, :] + p_ref[2:3, :]
        o_ref[...] = out.astype(o_ref.dtype)

    return kernel


def _select_row_tile(n_rows, k_pad, d_pad, in_item, out_item, tm_target, budget):
    """Largest MXU-filling row tile within the VMEM budget, keeping >= ~8 steps."""
    tm_cap = _round_up(max(-(-n_rows // 8), 256), 256)   # >= ~8 grid steps
    tm = min(_round_up(max(tm_target, 8), 256), tm_cap)
    tm = min(tm, n_rows)   # n_rows is already a multiple of 8
    tm = max(tm, 8)
    while True:
        est = (2 * tm * k_pad * in_item          # activation tile (double-buffered)
               + 2 * k_pad * d_pad * in_item      # resident weight (2 bufs today)
               + 2 * 8 * d_pad * 4                # params (sublane-padded)
               + 2 * tm * d_pad * out_item        # output tile (double-buffered)
               + 4 * tm * d_pad * 4)              # live f32 LayerNorm temporaries
        if est <= budget or tm <= 8:
            return tm, est
        tm = max(8, (tm // 2) // 8 * 8)


@functools.partial(
    jax.jit, static_argnames=("patch_size", "mxu_dtype", "tm", "out_dtype"))
def patch_embed(x, w_conv, b_conv, gamma, beta, *, patch_size,
                mxu_dtype=None, tm=1024, out_dtype=None):
    """x: (B, C, H, W) NCHW, like the PyTorch module. Returns (B, ph, pw, D).

    mxu_dtype: optional dtype (e.g. jnp.bfloat16) for the matmul operands — a
               fast path on every TPU generation (v5e/v6e/v7x take bf16 MXU
               operands natively). Accumulation and LayerNorm stay f32.
    out_dtype: optional output dtype (e.g. jnp.bfloat16) to halve writeback.
    """
    B, C, H, W = x.shape
    p = patch_size
    ph, pw = H // p, W // p
    D = w_conv.shape[0]
    K = C * p * p
    N = B * ph * pw
    out_dtype = x.dtype if out_dtype is None else out_dtype

    # Patchify to (N, K) with K in (C, kh, kw) order == the Conv2d contraction.
    # The whole wrapper is jitted, so this transpose, the optional cast and the
    # (rare) pads fuse into a single XLA pass over x.
    xp = x.reshape(B, C, ph, p, pw, p).transpose(0, 2, 4, 1, 3, 5).reshape(N, K)
    w = w_conv.reshape(D, K).T  # (K, D)
    if mxu_dtype is not None:
        xp = xp.astype(mxu_dtype)
        w = w.astype(mxu_dtype)

    # Lane-dense padding; skipped entirely when already aligned (ViT K=D=768).
    K_pad = _round_up(K, 128)
    D_pad = _round_up(D, 128)
    N_al = _round_up(N, 8)          # sublane-align rows only; no tm-multiple pad
    if (N_al, K_pad) != (N, K):
        xp = jnp.pad(xp, ((0, N_al - N), (0, K_pad - K)))
    if (K_pad, D_pad) != (K, D):
        w = jnp.pad(w, ((0, K_pad - K), (0, D_pad - D)))
    params = jnp.zeros((3, D_pad), jnp.float32)
    params = params.at[0, :D].set(b_conv.astype(jnp.float32))
    params = params.at[1, :D].set(gamma.astype(jnp.float32))
    params = params.at[2, :D].set(beta.astype(jnp.float32))

    # Generation-aware tile selection and scoped-VMEM limit.
    vmem_cap = _vmem_capacity_bytes()
    budget = int(0.70 * vmem_cap)   # headroom for compiler-internal scratch
    tm, est = _select_row_tile(N_al, K_pad, D_pad, xp.dtype.itemsize,
                               jnp.dtype(out_dtype).itemsize, tm, budget)
    vmem_limit = int(min(vmem_cap - (8 << 20),
                         max(est + (16 << 20), 32 << 20)))

    grid = (pl.cdiv(N_al, tm),)
    cost = pl.CostEstimate(
        flops=2 * N_al * K_pad * D_pad,
        transcendentals=0,
        bytes_accessed=(xp.size * xp.dtype.itemsize
                        + w.size * w.dtype.itemsize
                        + params.size * 4
                        + N_al * D_pad * jnp.dtype(out_dtype).itemsize),
    )

    out = pl.pallas_call(
        _make_patch_embed_kernel(D, D_pad),
        out_shape=jax.ShapeDtypeStruct((N_al, D_pad), out_dtype),
        grid_spec=pltpu.PrefetchScalarGridSpec(
            num_scalar_prefetch=0,
            grid=grid,
            in_specs=[
                pl.BlockSpec((tm, K_pad), lambda i: (i, 0)),
                # Constant index_maps: weight/params stay VMEM-resident across
                # the whole grid (fetched once).
                pl.BlockSpec((K_pad, D_pad), lambda i: (0, 0)),
                pl.BlockSpec((3, D_pad), lambda i: (0, 0)),
            ],
            out_specs=pl.BlockSpec((tm, D_pad), lambda i: (i, 0)),
        ),
        compiler_params=pltpu.CompilerParams(
            dimension_semantics=("parallel",),
            vmem_limit_bytes=vmem_limit,
        ),
        cost_estimate=cost,
    )(xp, w, params)

    return out[:N, :D].reshape(B, ph, pw, D)


def patch_embed_ref(x, w_conv, b_conv, gamma, beta, patch_size):
    """Plain-JAX reference mirroring the PyTorch forward."""
    B, C, H, W = x.shape
    p = patch_size
    ph, pw = H // p, W // p
    D = w_conv.shape[0]
    K = C * p * p
    xp = x.reshape(B, C, ph, p, pw, p).transpose(0, 2, 4, 1, 3, 5).reshape(-1, K)
    y = xp @ w_conv.reshape(D, K).T + b_conv
    mean = jnp.mean(y, axis=-1, keepdims=True)
    var = jnp.mean((y - mean) ** 2, axis=-1, keepdims=True)
    yn = (y - mean) / jnp.sqrt(var + EPS)
    return (yn * gamma + beta).reshape(B, ph, pw, D)


if __name__ == "__main__":
    # Small shapes consistent with the module: img_size=16, patch_size=4,
    # in_chans=4, embed_dim=32  ->  ph = pw = 4, num_patches = 16.
    B, C, IMG, P, D = 2, 4, 16, 4, 32

    key = jax.random.PRNGKey(0)
    kx, kw, kb, kg, kbe = jax.random.split(key, 5)
    x = jax.random.normal(kx, (B, C, IMG, IMG), dtype=jnp.float32)
    w_conv = 0.02 * jax.random.normal(kw, (D, C, P, P), dtype=jnp.float32)
    b_conv = 0.01 * jax.random.normal(kb, (D,), dtype=jnp.float32)
    gamma = jnp.ones((D,), dtype=jnp.float32) + 0.1 * jax.random.normal(
        kg, (D,), dtype=jnp.float32)
    beta = 0.1 * jax.random.normal(kbe, (D,), dtype=jnp.float32)

    ref = patch_embed_ref(x, w_conv, b_conv, gamma, beta, P)

    # f32 MXU path: matches the reference tightly.
    out = patch_embed(x, w_conv, b_conv, gamma, beta, patch_size=P)
    out = jax.block_until_ready(out)
    assert out.shape == (B, IMG // P, IMG // P, D)
    assert jnp.allclose(out, ref, atol=1e-4, rtol=1e-4)

    # bf16 MXU operands (fast path on all generations), f32 accumulation + LN.
    out_bf16 = patch_embed(x, w_conv, b_conv, gamma, beta, patch_size=P,
                           mxu_dtype=jnp.bfloat16)
    out_bf16 = jax.block_until_ready(out_bf16)
    assert out_bf16.shape == (B, IMG // P, IMG // P, D)
    assert jnp.allclose(out_bf16, ref, atol=5e-2, rtol=5e-2)

    print("KERNEL_OK")
</pallas_src>

<mosaic_0001>
module attributes {stable_mosaic.version = 11 : i64} {
  func.func @kernel(%arg0: i32, %arg1: memref<32x128xf32, #tpu.memory_space<vmem>>, %arg2: memref<128x128xf32, #tpu.memory_space<vmem>>, %arg3: memref<3x128xf32, #tpu.memory_space<vmem>>, %arg4: memref<32x128xf32, #tpu.memory_space<vmem>>) attributes {dimension_semantics = [#tpu.dimension_semantics<parallel>], iteration_bounds = array<i64: 1>, scalar_prefetch = 0 : i64, scratch_operands = 0 : i64, tpu.core_type = #tpu.core_type<tc>, window_params = [{transform_indices = @transform_0, window_bounds = array<i64: 32, 128>}, {pipeline_mode = #tpu.pipeline_mode<synchronous>, transform_indices = @transform_1, window_bounds = array<i64: 128, 128>}, {pipeline_mode = #tpu.pipeline_mode<synchronous>, transform_indices = @transform_2, window_bounds = array<i64: 3, 128>}, {transform_indices = @transform_3, window_bounds = array<i64: 32, 128>}]} {
    %c0 = arith.constant 0 : index
    %c0_0 = arith.constant 0 : index
    %0 = vector.load %arg1[%c0, %c0_0] : memref<32x128xf32, #tpu.memory_space<vmem>>, vector<32x128xf32>
    %c0_1 = arith.constant 0 : index
    %c0_2 = arith.constant 0 : index
    %1 = vector.load %arg2[%c0_1, %c0_2] : memref<128x128xf32, #tpu.memory_space<vmem>>, vector<128x128xf32>
    %cst = arith.constant dense<0.000000e+00> : vector<32x128xf32>
    %2 = tpu.matmul %0, %1, %cst {dimension_numbers = #tpu.dot_dimension_numbers<[1], [0], [0], [1], [0, 0, 1, 1], [], []>} : vector<32x128xf32>, vector<128x128xf32>, vector<32x128xf32> -> vector<32x128xf32>
    %c0_3 = arith.constant 0 : index
    %c0_4 = arith.constant 0 : index
    %3 = vector.load %arg3[%c0_3, %c0_4] : memref<3x128xf32, #tpu.memory_space<vmem>>, vector<1x128xf32>
    %4 = vector.broadcast %3 : vector<1x128xf32> to vector<32x128xf32>
    %5 = arith.addf %2, %4 : vector<32x128xf32>
    %cst_5 = arith.constant dense<0.000000e+00> : vector<32xf32>
    %6 = vector.multi_reduction <add>, %5, %cst_5 [1] : vector<32x128xf32> to vector<32xf32>
    %7 = vector.shape_cast %6 : vector<32xf32> to vector<32x1xf32>
    %cst_6 = arith.constant 3.125000e-02 : f32
    %8 = vector.broadcast %cst_6 : f32 to vector<32x1xf32>
    %9 = arith.mulf %7, %8 : vector<32x1xf32>
    %10 = vector.broadcast %9 : vector<32x1xf32> to vector<32x128xf32>
    %11 = arith.subf %5, %10 : vector<32x128xf32>
    %12 = tpu.iota {dimensions = array<i32: 1>} : vector<32x128xi32>
    %c32_i32 = arith.constant 32 : i32
    %13 = vector.broadcast %c32_i32 : i32 to vector<32x128xi32>
    %14 = arith.cmpi slt, %12, %13 : vector<32x128xi32>
    %cst_7 = arith.constant 0.000000e+00 : f32
    %15 = vector.broadcast %cst_7 : f32 to vector<32x128xf32>
    %16 = arith.select %14, %11, %15 : vector<32x128xi1>, vector<32x128xf32>
    %17 = arith.mulf %16, %16 : vector<32x128xf32>
    %cst_8 = arith.constant dense<0.000000e+00> : vector<32xf32>
    %18 = vector.multi_reduction <add>, %17, %cst_8 [1] : vector<32x128xf32> to vector<32xf32>
    %19 = vector.shape_cast %18 : vector<32xf32> to vector<32x1xf32>
    %cst_9 = arith.constant 3.125000e-02 : f32
    %20 = vector.broadcast %cst_9 : f32 to vector<32x1xf32>
    %21 = arith.mulf %19, %20 : vector<32x1xf32>
    %cst_10 = arith.constant 9.99999997E-7 : f32
    %22 = vector.broadcast %cst_10 : f32 to vector<32x1xf32>
    %23 = arith.addf %21, %22 : vector<32x1xf32>
    %24 = math.rsqrt %23 : vector<32x1xf32>
    %25 = vector.broadcast %24 : vector<32x1xf32> to vector<32x128xf32>
    %26 = arith.mulf %11, %25 : vector<32x128xf32>
    %c1 = arith.constant 1 : index
    %c0_11 = arith.constant 0 : index
    %27 = vector.load %arg3[%c1, %c0_11] : memref<3x128xf32, #tpu.memory_space<vmem>>, vector<1x128xf32>
    %28 = vector.broadcast %27 : vector<1x128xf32> to vector<32x128xf32>
    %29 = arith.mulf %26, %28 : vector<32x128xf32>
    %c2 = arith.constant 2 : index
    %c0_12 = arith.constant 0 : index
    %30 = vector.load %arg3[%c2, %c0_12] : memref<3x128xf32, #tpu.memory_space<vmem>>, vector<1x128xf32>
    %31 = vector.broadcast %30 : vector<1x128xf32> to vector<32x128xf32>
    %32 = arith.addf %29, %31 : vector<32x128xf32>
    %c0_13 = arith.constant 0 : index
    %c0_14 = arith.constant 0 : index
    %33 = vector.load %arg4[%c0_13, %c0_14] : memref<32x128xf32, #tpu.memory_space<vmem>>, vector<32x128xf32>
    tpu.vector_store %arg4[%c0_13, %c0_14], %32 {strides = array<i32>} : memref<32x128xf32, #tpu.memory_space<vmem>>, vector<32x128xf32>,
    return
  }
  func.func @transform_0(%arg0: i32) -> (i32, i32) {
    %c0_i32 = arith.constant 0 : i32
    %c0_i32_0 = arith.constant 0 : i32
    return %arg0, %c0_i32 : i32, i32
  }
  func.func @transform_1(%arg0: i32) -> (i32, i32) {
    %c0_i32 = arith.constant 0 : i32
    %c0_i32_0 = arith.constant 0 : i32
    %c0_i32_1 = arith.constant 0 : i32
    return %c0_i32, %c0_i32_0 : i32, i32
  }
  func.func @transform_2(%arg0: i32) -> (i32, i32) {
    %c0_i32 = arith.constant 0 : i32
    %c0_i32_0 = arith.constant 0 : i32
    %c0_i32_1 = arith.constant 0 : i32
    return %c0_i32, %c0_i32_0 : i32, i32
  }
  func.func @transform_3(%arg0: i32) -> (i32, i32) {
    %c0_i32 = arith.constant 0 : i32
    %c0_i32_0 = arith.constant 0 : i32
    return %arg0, %c0_i32 : i32, i32
  }
}

</mosaic_0001>

<bundles_post_ra>
// kernel: patch_embed.1
= control target key start
LH: loop header
LB: loop body
LE: loop exit
PB: predicated region body
PF: predicated region fallthrough
CT: control target
= control target key end

     0   :  { %s386_s0 = inlined_call_operand.vmem [shape: f32[32,128], index: 0, kind: input, shape index: {}]   ;;  %s387_s1 = inlined_call_operand.vmem [shape: f32[128,128], index: 1, kind: input, shape index: {}]   ;;  %s388_s2 = inlined_call_operand.vmem [shape: f32[3,128], index: 2, kind: input, shape index: {}]   ;;  %s389_s3 = inlined_call_operand.hbm [shape: f32[32,128], index: 3, kind: output, shape index: {}]  }
   0x1   :  { %v34_v0 = vld [vmem:[%s387_s1 + $0x78] sm:$0xff]  ;;  %v33_v1 = vld [vmem:[%s387_s1 + $0x70] sm:$0xff]  ;;  %v32_v2 = vld [vmem:[%s387_s1 + $0x68] sm:$0xff] }
   0x2   :  { %37 = vmatpush.msra.mxu0 %v34_v0  ;;  %188 = vmatpush.msra.mxu2 %v34_v0  ;;  %v31_v3 = vld [vmem:[%s387_s1 + $0x60] sm:$0xff]  ;;  %v30_v4 = vld [vmem:[%s387_s1 + $0x58] sm:$0xff]  ;;  %v29_v5 = vld [vmem:[%s387_s1 + $0x50] sm:$0xff] }
   0x3   :  { %187 = vmatpush.msra.mxu1 %v34_v0  ;;  %189 = vmatpush.msra.mxu3 %v34_v0 }
   0x4   :  { %38 = vmatpush.msra.mxu0 %v33_v1  ;;  %191 = vmatpush.msra.mxu2 %v33_v1 }
   0x5   :  { %190 = vmatpush.msra.mxu1 %v33_v1  ;;  %192 = vmatpush.msra.mxu3 %v33_v1 }
   0x6   :  { %39 = vmatpush.msra.mxu0 %v32_v2  ;;  %194 = vmatpush.msra.mxu2 %v32_v2 }
   0x7   :  { %193 = vmatpush.msra.mxu1 %v32_v2  ;;  %195 = vmatpush.msra.mxu3 %v32_v2 }
   0x8   :  { %40 = vmatpush.msra.mxu0 %v31_v3  ;;  %197 = vmatpush.msra.mxu2 %v31_v3 }
   0x9   :  { %196 = vmatpush.msra.mxu1 %v31_v3  ;;  %198 = vmatpush.msra.mxu3 %v31_v3 }
   0xa   :  { %8 = vsyncpa [#allocation3], 0  ;;  %41 = vmatpush.msra.mxu0 %v30_v4  ;;  %200 = vmatpush.msra.mxu2 %v30_v4  ;;  %v28_v6 = vld [vmem:[%s387_s1 + $0x48] sm:$0xff]  ;;  %v27_v7 = vld [vmem:[%s387_s1 + $0x40] sm:$0xff]  ;;  %v82_v29 = vlaneseq  ;;  %s175_s5 = sshll.u32 %s389_s3, 4  ;;  %s276_s6 = smov 128   ;;  %s176_s5 = int_to_ptr.hbm [resolvable:$true] %s175_s5 }
   0xb   :  { %199 = vmatpush.msra.mxu1 %v30_v4  ;;  %201 = vmatpush.msra.mxu3 %v30_v4  ;;  %v26_v8 = vld [vmem:[%s387_s1 + $0x38] sm:$0xff]  ;;  %v25_v9 = vld [vmem:[%s387_s1 + $0x30] sm:$0xff]  ;;  %v24_v10 = vld [vmem:[%s387_s1 + $0x28] sm:$0xff]  ;;  %s277_s7 = smov 8  }
   0xc   :  { %42 = vmatpush.msra.mxu0 %v29_v5  ;;  %203 = vmatpush.msra.mxu2 %v29_v5  ;;  %v23_v11 = vld [vmem:[%s387_s1 + $0x20] sm:$0xff]  ;;  %v22_v12 = vld [vmem:[%s387_s1 + $0x18] sm:$0xff]  ;;  %v21_v13 = vld [vmem:[%s387_s1 + $0x10] sm:$0xff]  ;;  %v83_v30 = vand.u32 127, %v82_v29 }
   0xd   :  { %202 = vmatpush.msra.mxu1 %v29_v5  ;;  %204 = vmatpush.msra.mxu3 %v29_v5  ;;  %v20_v14 = vld [vmem:[%s387_s1 + $0x8] sm:$0xff]  ;;  %v19_v15 = vld [vmem:[%s387_s1] sm:$0xff]  ;;  %v17_v17 = vld [vmem:[%s386_s0 + $0x10] sm:$0xff] }
   0xe   :  { %43 = vmatpush.msra.mxu0 %v28_v6  ;;  %206 = vmatpush.msra.mxu2 %v28_v6  ;;  %v15_v16 = vld [vmem:[%s386_s0] sm:$0xff]  ;;  %v16_v18 = vld [vmem:[%s386_s0 + $0x8] sm:$0xff]  ;;  %v18_v19 = vld [vmem:[%s386_s0 + $0x18] sm:$0xff]  ;;  %vm84_vm0 = vcmp.lt.s32.totalorder %v83_v30, 32 }
   0xf   :  { %205 = vmatpush.msra.mxu1 %v28_v6  ;;  %207 = vmatpush.msra.mxu3 %v28_v6  ;;  %v238_v20 = vld [vmem:[%s388_s2] ss:$0 sm:$0xff] }
  0x10   :  { %44 = vmatpush.msra.mxu0 %v27_v7  ;;  %209 = vmatpush.msra.mxu2 %v27_v7 }
  0x11   :  { %208 = vmatpush.msra.mxu1 %v27_v7  ;;  %210 = vmatpush.msra.mxu3 %v27_v7 }
  0x12   :  { %45 = vmatpush.msra.mxu0 %v26_v8  ;;  %212 = vmatpush.msra.mxu2 %v26_v8 }
  0x13   :  { %211 = vmatpush.msra.mxu1 %v26_v8  ;;  %213 = vmatpush.msra.mxu3 %v26_v8 }
  0x14   :  { %46 = vmatpush.msra.mxu0 %v25_v9  ;;  %215 = vmatpush.msra.mxu2 %v25_v9 }
  0x15   :  { %214 = vmatpush.msra.mxu1 %v25_v9  ;;  %216 = vmatpush.msra.mxu3 %v25_v9 }
  0x16   :  { %47 = vmatpush.msra.mxu0 %v24_v10  ;;  %218 = vmatpush.msra.mxu2 %v24_v10 }
  0x17   :  { %217 = vmatpush.msra.mxu1 %v24_v10  ;;  %219 = vmatpush.msra.mxu3 %v24_v10  ;;  %v239_v10 = vld [vmem:[%s388_s2 + $0x1] ss:$0 sm:$0xff] }
  0x18   :  { %48 = vmatpush.msra.mxu0 %v23_v11  ;;  %221 = vmatpush.msra.mxu2 %v23_v11 }
  0x19   :  { %220 = vmatpush.msra.mxu1 %v23_v11  ;;  %222 = vmatpush.msra.mxu3 %v23_v11 }
  0x1a   :  { %49 = vmatpush.msra.mxu0 %v22_v12  ;;  %224 = vmatpush.msra.mxu2 %v22_v12 }
  0x1b   :  { %223 = vmatpush.msra.mxu1 %v22_v12  ;;  %225 = vmatpush.msra.mxu3 %v22_v12 }
  0x1c   :  { %50 = vmatpush.msra.mxu0 %v21_v13  ;;  %227 = vmatpush.msra.mxu2 %v21_v13 }
  0x1d   :  { %226 = vmatpush.msra.mxu1 %v21_v13  ;;  %228 = vmatpush.msra.mxu3 %v21_v13 }
  0x1e   :  { %51 = vmatpush.msra.mxu0 %v20_v14  ;;  %230 = vmatpush.msra.mxu2 %v20_v14 }
  0x1f   :  { %229 = vmatpush.msra.mxu1 %v20_v14  ;;  %231 = vmatpush.msra.mxu3 %v20_v14  ;;  %v240_v14 = vld [vmem:[%s388_s2 + $0x2] ss:$0 sm:$0xff]  ;;  %s275_s2 = smov [#allocation2]  }
  0x20   :  { %52 = vmatpush.msra.mxu0 %v19_v15  ;;  %233 = vmatpush.msra.mxu2 %v19_v15  ;;  %s173_s29 = sshll.u32 %s275_s2, 4  ;;  %s174_s29 = int_to_ptr.vmem [resolvable:$true] %s173_s29 }
  0x21   :  { %53 = vmatmul.f32.vlgmr.msra.gmra.mxu0 %v15_v16  ;;  %59 = vmatmul.f32.vlgmr.msra.gmra.mxu2 %v17_v17 }
  0x22   :  { %232 = vmatpush.msra.mxu1 %v19_v15  ;;  %234 = vmatpush.msra.mxu3 %v19_v15 }
  0x23   :  { %56 = vmatmul.f32.vlgmr.msra.gmra.mxu1 %v16_v18  ;;  %62 = vmatmul.f32.vlgmr.msra.gmra.mxu3 %v18_v19 }
  0x9e   :  { %v54_v21 = vpop.f32.mrf.mxu0 }
  0x9f   :  { %v55_v22 = vadd.f32 %v238_v20, %v54_v21 }
  0xa0   :  { %v57_v23 = vpop.f32.mrf.mxu1 }
  0xa1   :  { %66 = vadd.xlane.f32.xlu0 %v55_v22  ;;  %v58_v26 = vadd.f32 %v238_v20, %v57_v23 }
  0xa4   :  { %v60_v24 = vpop.f32.mrf.mxu2 }
  0xa5   :  { %v61_v25 = vadd.f32 %v238_v20, %v60_v24 }
  0xa6   :  { %v63_v27 = vpop.f32.mrf.mxu3 }
  0xa7   :  { %70 = vadd.xlane.f32.xlu1 %v61_v25  ;;  %v64_v28 = vadd.f32 %v238_v20, %v63_v27 }
  0xa9   :  { %68 = vadd.xlane.f32.xlu0 %v58_v26 }
  0xaf   :  { %72 = vadd.xlane.f32.xlu1 %v64_v28 }
 0x114   :  { %v67_v31 = vpop.xlane.xlu0 %66 }
 0x115   :  { %v74_v32 = vmul.f32 0.03125, %v67_v31 }
 0x117   :  { %v78_v33 = vsub.f32 %v55_v22, %v74_v32 }
 0x119   :  { %v85_v34 = vsel %vm84_vm0, %v78_v33, 0.0 }
 0x11a   :  { %v71_v35 = vpop.xlane.xlu1 %70  ;;  %v89_v36 = vmul.f32 %v85_v34, %v85_v34 }
 0x11b   :  { %v76_v37 = vmul.f32 0.03125, %v71_v35 }
 0x11c   :  { %93 = vadd.xlane.f32.xlu2 %v89_v36  ;;  %v69_v38 = vpop.xlane.xlu0 %68 }
 0x11d   :  { %v362_v39 = vsub.f32 %v61_v25, %v76_v37  ;;  %v75_v40 = vmul.f32 0.03125, %v69_v38 }
 0x11f   :  { %v364_v41 = vsub.f32 %v58_v26, %v75_v40  ;;  %v87_v42 = vsel %vm84_vm0, %v362_v39, 0.0 }
 0x120   :  { %v91_v43 = vmul.f32 %v87_v42, %v87_v42 }
 0x121   :  { %v86_v44 = vsel %vm84_vm0, %v364_v41, 0.0 }
 0x122   :  { %v73_v45 = vpop.xlane.xlu1 %72  ;;  %97 = vadd.xlane.f32.xlu0 %v91_v43  ;;  %v90_v46 = vmul.f32 %v86_v44, %v86_v44 }
 0x123   :  { %v77_v47 = vmul.f32 0.03125, %v73_v45 }
 0x124   :  { %95 = vadd.xlane.f32.xlu2 %v90_v46 }
 0x125   :  { %v370_v48 = vsub.f32 %v64_v28, %v77_v47 }
 0x127   :  { %v88_v49 = vsel %vm84_vm0, %v370_v48, 0.0 }
 0x128   :  { %v92_v50 = vmul.f32 %v88_v49, %v88_v49 }
 0x12a   :  { %99 = vadd.xlane.f32.xlu1 %v92_v50 }
 0x18f   :  { %v94_v51 = vpop.xlane.xlu2 %93 }
 0x190   :  { %v101_v52 = vmul.f32 0.03125, %v94_v51 }
 0x192   :  { %v105_v53 = vadd.f32 1e-06, %v101_v52 }
 0x194   :  { %241 = vrsqrt.f32 %v105_v53  ;;  %vm115_vm2 = vweird.f32 %v105_v53 }
 0x195   :  { %v98_v54 = vpop.xlane.xlu0 %97 }
 0x196   :  { %v103_v55 = vmul.f32 0.03125, %v98_v54 }
 0x197   :  { %v96_v56 = vpop.xlane.xlu2 %95 }
 0x198   :  { %v107_v57 = vadd.f32 1e-06, %v103_v55  ;;  %v102_v58 = vmul.f32 0.03125, %v96_v56 }
 0x19a   :  { %v242_v59 = vpop.eup %241  ;;  %243 = vrsqrt.f32 %v107_v57  ;;  %v106_v60 = vadd.f32 1e-06, %v102_v58  ;;  %vm135_vm5 = vweird.f32 %v107_v57 }
 0x19b   :  { %v110_v61 = vmul.f32 %v242_v59, %v105_v53  ;;  %vm116_vm1 = vweird.f32 %v242_v59 }
 0x19c   :  { %245 = vrsqrt.f32 %v106_v60  ;;  %vm117_vm3 = vmor %vm115_vm2, %vm116_vm1  ;;  %vm125_vm8 = vweird.f32 %v106_v60 }
 0x19d   :  { %v111_v62 = vmul.f32 %v242_v59, %v110_v61  ;;  %v100_v63 = vpop.xlane.xlu1 %99 }
 0x19e   :  { %v104_v0 = vmul.f32 0.03125, %v100_v63 }
 0x19f   :  { %v112_v1 = vmul.f32 0.5, %v111_v62 }
 0x1a0   :  { %v244_v2 = vpop.eup %243  ;;  %v108_v3 = vadd.f32 1e-06, %v104_v0 }
 0x1a1   :  { %v113_v4 = vsub.f32 1.5, %v112_v1  ;;  %v130_v5 = vmul.f32 %v244_v2, %v107_v57  ;;  %vm136_vm4 = vweird.f32 %v244_v2 }
 0x1a2   :  { %v246_v6 = vpop.eup %245  ;;  %247 = vrsqrt.f32 %v108_v3  ;;  %vm137_vm7 = vmor %vm135_vm5, %vm136_vm4  ;;  %vm145_vm11 = vweird.f32 %v108_v3 }
 0x1a3   :  { %v114_v7 = vmul.f32 %v242_v59, %v113_v4  ;;  %v131_v8 = vmul.f32 %v244_v2, %v130_v5  ;;  %v120_v9 = vmul.f32 %v246_v6, %v106_v60  ;;  %vm126_vm6 = vweird.f32 %v246_v6 }
 0x1a4   :  { %vm127_vm9 = vmor %vm125_vm8, %vm126_vm6 }
 0x1a5   :  { %v118_v11 = vsel %vm117_vm3, %v242_v59, %v114_v7  ;;  %v132_v12 = vmul.f32 0.5, %v131_v8  ;;  %v121_v13 = vmul.f32 %v246_v6, %v120_v9 }
 0x1a6   :  { %v149_v15 = vmul.f32 %v118_v11, %v78_v33 }
 0x1a7   :  { %v133_v16 = vsub.f32 1.5, %v132_v12  ;;  %v122_v17 = vmul.f32 0.5, %v121_v13 }
 0x1a8   :  { %v248_v18 = vpop.eup %247  ;;  %v155_v19 = vmul.f32 %v239_v10, %v149_v15 }
 0x1a9   :  { %v134_v20 = vmul.f32 %v244_v2, %v133_v16  ;;  %v123_v21 = vsub.f32 1.5, %v122_v17  ;;  %v140_v22 = vmul.f32 %v248_v18, %v108_v3  ;;  %vm146_vm10 = vweird.f32 %v248_v18 }
 0x1aa   :  { %v161_v23 = vadd.f32 %v240_v14, %v155_v19  ;;  %vm147_vm12 = vmor %vm145_vm11, %vm146_vm10 }
 0x1ab   :  { %v138_v24 = vsel %vm137_vm7, %v244_v2, %v134_v20  ;;  %v124_v25 = vmul.f32 %v246_v6, %v123_v21  ;;  %v141_v26 = vmul.f32 %v248_v18, %v140_v22 }
 0x1ac   :  { %165 = vst [vmem:[#allocation2] sm:$0xff] %v161_v23  ;;  %v151_v27 = vmul.f32 %v138_v24, %v362_v39 }
 0x1ad   :  { %v128_v28 = vsel %vm127_vm9, %v246_v6, %v124_v25  ;;  %v142_v29 = vmul.f32 0.5, %v141_v26 }
 0x1ae   :  { %v157_v30 = vmul.f32 %v239_v10, %v151_v27  ;;  %v150_v31 = vmul.f32 %v128_v28, %v364_v41 }
 0x1af   :  { %v143_v32 = vsub.f32 1.5, %v142_v29 }
 0x1b0   :  { %v163_v33 = vadd.f32 %v240_v14, %v157_v30  ;;  %v156_v34 = vmul.f32 %v239_v10, %v150_v31 }
 0x1b1   :  { %v144_v35 = vmul.f32 %v248_v18, %v143_v32 }
 0x1b2   :  { %167 = vst [vmem:[#allocation2 + $0x10] sm:$0xff] %v163_v33  ;;  %v162_v36 = vadd.f32 %v240_v14, %v156_v34 }
 0x1b3   :  { %v148_v37 = vsel %vm147_vm12, %v248_v18, %v144_v35 }
 0x1b4   :  { %166 = vst [vmem:[#allocation2 + $0x8] sm:$0xff] %v162_v36  ;;  %v152_v38 = vmul.f32 %v148_v37, %v370_v48 }
 0x1b6   :  { %v158_v39 = vmul.f32 %v239_v10, %v152_v38 }
 0x1b8   :  { %v164_v40 = vadd.f32 %v240_v14, %v158_v39 }
 0x1ba   :  { %168 = vst [vmem:[#allocation2 + $0x18] sm:$0xff] %v164_v40 }
 0x1bb   :  { %181 = dma.vmem_to_hbm [thread:$0]  %s174_s29, 512, %s176_s5, [#allocation3], %s276_s6, %s276_s6, %s277_s7  }
 0x1bc   :  { %273 = dma.done.wait [#allocation3], 512  }
 0x1bd   :  { %274 = vsyncadd [#allocation3], 4294966784 }
 0x1be   :  { %186 = vsyncpa [#allocation3], 1 }

</bundles_post_ra>
